<compile_context>
chip_gen: v5e
topology: v5e:2x2
jax: 0.10.0
libtpu: 0.0.40
codegen_flags: <defaults>
</compile_context>

<pallas_src>
import jax
import jax.numpy as jnp
from jax import lax
from jax.experimental import pallas as pl
from jax.experimental.pallas import tpu as pltpu


def _gat_kernel(idx_ref, x_ref, wa1_ref, wa2_ref, o_ref):
    # idx_ref: (tn, m)  int32 0-based neighbor ids for this node block
    # x_ref:   (n, d)   full node features, VMEM resident (same block every step)
    # wa1_ref: (d, 1)   W^T @ a1   (folded attention vector for the center node)
    # wa2_ref: (d, 1)   W^T @ a2   (folded attention vector for the neighbors)
    # o_ref:   (tn, d)  output u for this node block
    i = pl.program_id(0)
    tn, d = o_ref.shape
    n = x_ref.shape[0]
    m = idx_ref.shape[1]

    x_all = x_ref[...]                                     # (n, d)
    row0 = pl.multiple_of(i * tn, tn)
    xb = x_ref[pl.ds(row0, tn), :]                         # (tn, d) this node block
    wa1 = wa1_ref[...]                                     # (d, 1)
    wa2 = wa2_ref[...]                                     # (d, 1)
    idx = idx_ref[...]                                     # (tn, m)

    # Center-node score term: x @ (W^T a1)
    s1 = jnp.dot(xb, wa1, preferred_element_type=jnp.float32)      # (tn, 1)

    # Gather neighbor rows via one-hot selectors (exact), one MXU matmul per
    # neighbor column; m is small and static so this Python loop is unrolled.
    lane_ids = lax.broadcasted_iota(jnp.int32, (tn, n), 1)          # (tn, n)
    z_cols = []
    s2_cols = []
    for j in range(m):
        onehot_j = (idx[:, j:j + 1] == lane_ids).astype(x_all.dtype)        # (tn, n)
        z_j = jnp.dot(onehot_j, x_all, preferred_element_type=jnp.float32)  # (tn, d)
        s2_cols.append(jnp.dot(z_j, wa2, preferred_element_type=jnp.float32))
        z_cols.append(z_j)

    # Lane-oriented scores: (tn, m) with the neighbor axis on lanes.
    score = s1 + jnp.concatenate(s2_cols, axis=1)                   # (tn, m)

    # LeakyReLU (PyTorch default negative_slope = 0.01)
    score = jnp.where(score >= 0, score, 0.01 * score)

    # Softmax over the m neighbors (last / lane axis).
    score = score - jnp.max(score, axis=1, keepdims=True)
    e = jnp.exp(score)
    alpha = e / jnp.sum(e, axis=1, keepdims=True)                   # (tn, m)

    # Attention-weighted sum of the raw neighbor features.
    u = jnp.zeros((tn, d), jnp.float32)
    for j in range(m):
        u = u + alpha[:, j:j + 1] * z_cols[j]                       # (tn, d)

    # ELU (alpha = 1.0); clamp before exp so the discarded positive branch
    # cannot overflow and costs no extra EUP range.
    u = jnp.where(u > 0, u, jnp.exp(jnp.minimum(u, 0.0)) - 1.0)
    o_ref[...] = u.astype(o_ref.dtype)


def gat_agg(x, x_nb, w_weight, a_weight, *, tn=None):
    """x: (n, d) float32, x_nb: (n, m) int32 1-based neighbor indices."""
    n, d = x.shape
    m = x_nb.shape[1]

    # Node-block size: a single block at small n; multiples of 8 otherwise
    # (second-to-last block dim constraint).  For v5e/v6e/v7x one would pick
    # 128/256-aligned tn and >=2 blocks to feed both v7x TensorCores.
    if tn is None:
        tn = n if n <= 256 else 256
    if n % tn != 0 or (tn < n and tn % 8 != 0):
        tn = n

    idx = (x_nb - 1).astype(jnp.int32)                   # 0-based neighbor ids, (n, m)

    # Fold the attention vectors through W in the wrapper:
    #   a(cat(W x, W z)) == x @ (W^T a1) + z @ (W^T a2)
    a1 = a_weight[0, :d]
    a2 = a_weight[0, d:]
    wa1 = (w_weight.T @ a1).reshape(d, 1)
    wa2 = (w_weight.T @ a2).reshape(d, 1)

    out = pl.pallas_call(
        _gat_kernel,
        out_shape=jax.ShapeDtypeStruct((n, d), x.dtype),
        grid_spec=pltpu.PrefetchScalarGridSpec(
            num_scalar_prefetch=0,
            grid=(n // tn,),
            in_specs=[
                pl.BlockSpec((tn, m), lambda i: (i, 0)),   # neighbor ids, per node block
                pl.BlockSpec((n, d), lambda i: (0, 0)),    # x, VMEM resident (no re-DMA)
                pl.BlockSpec((d, 1), lambda i: (0, 0)),    # W^T a1
                pl.BlockSpec((d, 1), lambda i: (0, 0)),    # W^T a2
            ],
            out_specs=pl.BlockSpec((tn, d), lambda i: (i, 0)),
        ),
        compiler_params=pltpu.CompilerParams(
            dimension_semantics=("parallel",)),
    )(idx, x, wa1, wa2)
    return out


def gat_agg_ref(x, x_nb, w_weight, a_weight):
    """Pure-JAX reference mirroring the PyTorch forward (un-folded math)."""
    n, d = x.shape
    m = x_nb.shape[1]
    z = x[x_nb - 1]                                        # (n, m, d)
    wx = x @ w_weight.T                                    # (n, d)
    wz = z @ w_weight.T                                    # (n, m, d)
    cat = jnp.concatenate(
        [jnp.broadcast_to(wx[:, None, :], (n, m, d)), wz], axis=-1)
    score = cat @ a_weight[0]                              # (n, m)
    score = jnp.where(score >= 0, score, 0.01 * score)     # leaky_relu
    alpha = jax.nn.softmax(score, axis=1)
    u = jnp.sum(alpha[..., None] * z, axis=1)
    return jnp.where(u > 0, u, jnp.exp(u) - 1.0)           # elu


if __name__ == "__main__":
    n, m, d = 8, 4, 32
    key = jax.random.PRNGKey(0)
    kx, knb, kw, ka = jax.random.split(key, 4)

    x = jax.random.normal(kx, (n, d), dtype=jnp.float32)
    x_nb = jax.random.randint(knb, (n, m), 1, n + 1, dtype=jnp.int32)  # 1-based

    # Deterministic xavier_normal_-style init (same std as torch's formula).
    w_weight = jax.random.normal(kw, (d, d), dtype=jnp.float32) * (2.0 / (d + d)) ** 0.5
    a_weight = jax.random.normal(ka, (1, 2 * d), dtype=jnp.float32) * (2.0 / (1 + 2 * d)) ** 0.5

    u = gat_agg(x, x_nb, w_weight, a_weight)
    jax.block_until_ready(u)

    u_ref = gat_agg_ref(x, x_nb, w_weight, a_weight)
    assert u.shape == (n, d)
    # Folding (W^T a) in the wrapper reassociates the score dot products, so allow
    # a few extra ulps versus the un-folded reference.
    assert jnp.allclose(u, u_ref, atol=2e-5, rtol=2e-5), "mismatch vs reference"
    print("KERNEL_OK")
</pallas_src>

<mosaic_0001>
module attributes {stable_mosaic.version = 11 : i64} {
  func.func @_gat_kernel(%arg0: i32, %arg1: memref<8x4xi32, #tpu.memory_space<vmem>>, %arg2: memref<8x32xf32, #tpu.memory_space<vmem>>, %arg3: memref<32x1xf32, #tpu.memory_space<vmem>>, %arg4: memref<32x1xf32, #tpu.memory_space<vmem>>, %arg5: memref<8x32xf32, #tpu.memory_space<vmem>>) attributes {dimension_semantics = [#tpu.dimension_semantics<parallel>], iteration_bounds = array<i64: 1>, scalar_prefetch = 0 : i64, scratch_operands = 0 : i64, tpu.core_type = #tpu.core_type<tc>, window_params = [{transform_indices = @transform_0, window_bounds = array<i64: 8, 4>}, {pipeline_mode = #tpu.pipeline_mode<synchronous>, transform_indices = @transform_1, window_bounds = array<i64: 8, 32>}, {pipeline_mode = #tpu.pipeline_mode<synchronous>, transform_indices = @transform_2, window_bounds = array<i64: 32, 1>}, {pipeline_mode = #tpu.pipeline_mode<synchronous>, transform_indices = @transform_3, window_bounds = array<i64: 32, 1>}, {transform_indices = @transform_4, window_bounds = array<i64: 8, 32>}]} {
    %c0 = arith.constant 0 : index
    %c0_0 = arith.constant 0 : index
    %0 = vector.load %arg2[%c0, %c0_0] : memref<8x32xf32, #tpu.memory_space<vmem>>, vector<8x32xf32>
    %c8_i32 = arith.constant 8 : i32
    %1 = arith.muli %arg0, %c8_i32 : i32
    %2 = tpu.assume_multiple %1, 8 : i32
    %3 = arith.index_cast %2 : i32 to index
    %c0_1 = arith.constant 0 : index
    %4 = vector.load %arg2[%3, %c0_1] : memref<8x32xf32, #tpu.memory_space<vmem>>, vector<8x32xf32>
    %c0_2 = arith.constant 0 : index
    %c0_3 = arith.constant 0 : index
    %5 = vector.load %arg3[%c0_2, %c0_3] : memref<32x1xf32, #tpu.memory_space<vmem>>, vector<32x1xf32>
    %c0_4 = arith.constant 0 : index
    %c0_5 = arith.constant 0 : index
    %6 = vector.load %arg4[%c0_4, %c0_5] : memref<32x1xf32, #tpu.memory_space<vmem>>, vector<32x1xf32>
    %c0_6 = arith.constant 0 : index
    %c0_7 = arith.constant 0 : index
    %7 = vector.load %arg1[%c0_6, %c0_7] : memref<8x4xi32, #tpu.memory_space<vmem>>, vector<8x4xi32>
    %cst = arith.constant dense<0.000000e+00> : vector<8x1xf32>
    %8 = tpu.matmul %4, %5, %cst {dimension_numbers = #tpu.dot_dimension_numbers<[1], [0], [0], [1], [0, 0, 1, 1], [], []>} : vector<8x32xf32>, vector<32x1xf32>, vector<8x1xf32> -> vector<8x1xf32>
    %9 = tpu.iota {dimensions = array<i32: 1>} : vector<8x8xi32>
    %10 = vector.extract_strided_slice %7 {offsets = [0, 0], sizes = [8, 1], strides = [1, 1]} : vector<8x4xi32> to vector<8x1xi32>
    %11 = vector.broadcast %10 : vector<8x1xi32> to vector<8x8xi32>
    %12 = arith.cmpi eq, %11, %9 : vector<8x8xi32>
    %13 = arith.extui %12 : vector<8x8xi1> to vector<8x8xi32>
    %14 = arith.sitofp %13 : vector<8x8xi32> to vector<8x8xf32>
    %cst_8 = arith.constant dense<0.000000e+00> : vector<8x32xf32>
    %15 = tpu.matmul %14, %0, %cst_8 {dimension_numbers = #tpu.dot_dimension_numbers<[1], [0], [0], [1], [0, 0, 1, 1], [], []>} : vector<8x8xf32>, vector<8x32xf32>, vector<8x32xf32> -> vector<8x32xf32>
    %cst_9 = arith.constant dense<0.000000e+00> : vector<8x1xf32>
    %16 = tpu.matmul %15, %6, %cst_9 {dimension_numbers = #tpu.dot_dimension_numbers<[1], [0], [0], [1], [0, 0, 1, 1], [], []>} : vector<8x32xf32>, vector<32x1xf32>, vector<8x1xf32> -> vector<8x1xf32>
    %17 = vector.extract_strided_slice %7 {offsets = [0, 1], sizes = [8, 1], strides = [1, 1]} : vector<8x4xi32> to vector<8x1xi32>
    %18 = vector.broadcast %17 : vector<8x1xi32> to vector<8x8xi32>
    %19 = arith.cmpi eq, %18, %9 : vector<8x8xi32>
    %20 = arith.extui %19 : vector<8x8xi1> to vector<8x8xi32>
    %21 = arith.sitofp %20 : vector<8x8xi32> to vector<8x8xf32>
    %cst_10 = arith.constant dense<0.000000e+00> : vector<8x32xf32>
    %22 = tpu.matmul %21, %0, %cst_10 {dimension_numbers = #tpu.dot_dimension_numbers<[1], [0], [0], [1], [0, 0, 1, 1], [], []>} : vector<8x8xf32>, vector<8x32xf32>, vector<8x32xf32> -> vector<8x32xf32>
    %cst_11 = arith.constant dense<0.000000e+00> : vector<8x1xf32>
    %23 = tpu.matmul %22, %6, %cst_11 {dimension_numbers = #tpu.dot_dimension_numbers<[1], [0], [0], [1], [0, 0, 1, 1], [], []>} : vector<8x32xf32>, vector<32x1xf32>, vector<8x1xf32> -> vector<8x1xf32>
    %24 = vector.extract_strided_slice %7 {offsets = [0, 2], sizes = [8, 1], strides = [1, 1]} : vector<8x4xi32> to vector<8x1xi32>
    %25 = vector.broadcast %24 : vector<8x1xi32> to vector<8x8xi32>
    %26 = arith.cmpi eq, %25, %9 : vector<8x8xi32>
    %27 = arith.extui %26 : vector<8x8xi1> to vector<8x8xi32>
    %28 = arith.sitofp %27 : vector<8x8xi32> to vector<8x8xf32>
    %cst_12 = arith.constant dense<0.000000e+00> : vector<8x32xf32>
    %29 = tpu.matmul %28, %0, %cst_12 {dimension_numbers = #tpu.dot_dimension_numbers<[1], [0], [0], [1], [0, 0, 1, 1], [], []>} : vector<8x8xf32>, vector<8x32xf32>, vector<8x32xf32> -> vector<8x32xf32>
    %cst_13 = arith.constant dense<0.000000e+00> : vector<8x1xf32>
    %30 = tpu.matmul %29, %6, %cst_13 {dimension_numbers = #tpu.dot_dimension_numbers<[1], [0], [0], [1], [0, 0, 1, 1], [], []>} : vector<8x32xf32>, vector<32x1xf32>, vector<8x1xf32> -> vector<8x1xf32>
    %31 = vector.extract_strided_slice %7 {offsets = [0, 3], sizes = [8, 1], strides = [1, 1]} : vector<8x4xi32> to vector<8x1xi32>
    %32 = vector.broadcast %31 : vector<8x1xi32> to vector<8x8xi32>
    %33 = arith.cmpi eq, %32, %9 : vector<8x8xi32>
    %34 = arith.extui %33 : vector<8x8xi1> to vector<8x8xi32>
    %35 = arith.sitofp %34 : vector<8x8xi32> to vector<8x8xf32>
    %cst_14 = arith.constant dense<0.000000e+00> : vector<8x32xf32>
    %36 = tpu.matmul %35, %0, %cst_14 {dimension_numbers = #tpu.dot_dimension_numbers<[1], [0], [0], [1], [0, 0, 1, 1], [], []>} : vector<8x8xf32>, vector<8x32xf32>, vector<8x32xf32> -> vector<8x32xf32>
    %cst_15 = arith.constant dense<0.000000e+00> : vector<8x1xf32>
    %37 = tpu.matmul %36, %6, %cst_15 {dimension_numbers = #tpu.dot_dimension_numbers<[1], [0], [0], [1], [0, 0, 1, 1], [], []>} : vector<8x32xf32>, vector<32x1xf32>, vector<8x1xf32> -> vector<8x1xf32>
    %38 = tpu.concatenate %16, %23, %30, %37 in 1 : vector<8x1xf32>, vector<8x1xf32>, vector<8x1xf32>, vector<8x1xf32> -> vector<8x4xf32>
    %39 = vector.broadcast %8 : vector<8x1xf32> to vector<8x4xf32>
    %40 = arith.addf %39, %38 : vector<8x4xf32>
    %cst_16 = arith.constant 0.000000e+00 : f32
    %41 = vector.broadcast %cst_16 : f32 to vector<8x4xf32>
    %42 = arith.cmpf oge, %40, %41 : vector<8x4xf32>
    %cst_17 = arith.constant 0.00999999977 : f32
    %43 = vector.broadcast %cst_17 : f32 to vector<8x4xf32>
    %44 = arith.mulf %43, %40 : vector<8x4xf32>
    %45 = arith.select %42, %40, %44 : vector<8x4xi1>, vector<8x4xf32>
    %cst_18 = arith.constant dense<0xFF800000> : vector<8xf32>
    %46 = vector.multi_reduction <maximumf>, %45, %cst_18 [1] : vector<8x4xf32> to vector<8xf32>
    %47 = vector.shape_cast %46 : vector<8xf32> to vector<8x1xf32>
    %48 = vector.broadcast %47 : vector<8x1xf32> to vector<8x4xf32>
    %49 = arith.subf %45, %48 : vector<8x4xf32>
    %50 = math.exp %49 : vector<8x4xf32>
    %cst_19 = arith.constant dense<0.000000e+00> : vector<8xf32>
    %51 = vector.multi_reduction <add>, %50, %cst_19 [1] : vector<8x4xf32> to vector<8xf32>
    %52 = vector.shape_cast %51 : vector<8xf32> to vector<8x1xf32>
    %53 = vector.broadcast %52 : vector<8x1xf32> to vector<8x4xf32>
    %54 = arith.divf %50, %53 : vector<8x4xf32>
    %cst_20 = arith.constant 0.000000e+00 : f32
    %55 = vector.broadcast %cst_20 : f32 to vector<8x32xf32>
    %56 = vector.extract_strided_slice %54 {offsets = [0, 0], sizes = [8, 1], strides = [1, 1]} : vector<8x4xf32> to vector<8x1xf32>
    %57 = vector.broadcast %56 : vector<8x1xf32> to vector<8x32xf32>
    %58 = arith.mulf %57, %15 : vector<8x32xf32>
    %59 = arith.addf %55, %58 : vector<8x32xf32>
    %60 = vector.extract_strided_slice %54 {offsets = [0, 1], sizes = [8, 1], strides = [1, 1]} : vector<8x4xf32> to vector<8x1xf32>
    %61 = vector.broadcast %60 : vector<8x1xf32> to vector<8x32xf32>
    %62 = arith.mulf %61, %22 : vector<8x32xf32>
    %63 = arith.addf %59, %62 : vector<8x32xf32>
    %64 = vector.extract_strided_slice %54 {offsets = [0, 2], sizes = [8, 1], strides = [1, 1]} : vector<8x4xf32> to vector<8x1xf32>
    %65 = vector.broadcast %64 : vector<8x1xf32> to vector<8x32xf32>
    %66 = arith.mulf %65, %29 : vector<8x32xf32>
    %67 = arith.addf %63, %66 : vector<8x32xf32>
    %68 = vector.extract_strided_slice %54 {offsets = [0, 3], sizes = [8, 1], strides = [1, 1]} : vector<8x4xf32> to vector<8x1xf32>
    %69 = vector.broadcast %68 : vector<8x1xf32> to vector<8x32xf32>
    %70 = arith.mulf %69, %36 : vector<8x32xf32>
    %71 = arith.addf %67, %70 : vector<8x32xf32>
    %cst_21 = arith.constant 0.000000e+00 : f32
    %72 = vector.broadcast %cst_21 : f32 to vector<8x32xf32>
    %73 = arith.cmpf ogt, %71, %72 : vector<8x32xf32>
    %cst_22 = arith.constant 0.000000e+00 : f32
    %74 = vector.broadcast %cst_22 : f32 to vector<8x32xf32>
    %75 = arith.minimumf %71, %74 : vector<8x32xf32>
    %76 = math.exp %75 : vector<8x32xf32>
    %cst_23 = arith.constant 1.000000e+00 : f32
    %77 = vector.broadcast %cst_23 : f32 to vector<8x32xf32>
    %78 = arith.subf %76, %77 : vector<8x32xf32>
    %79 = arith.select %73, %71, %78 : vector<8x32xi1>, vector<8x32xf32>
    %c0_24 = arith.constant 0 : index
    %c0_25 = arith.constant 0 : index
    %80 = vector.load %arg5[%c0_24, %c0_25] : memref<8x32xf32, #tpu.memory_space<vmem>>, vector<8x32xf32>
    tpu.vector_store %arg5[%c0_24, %c0_25], %79 {strides = array<i32>} : memref<8x32xf32, #tpu.memory_space<vmem>>, vector<8x32xf32>,
    return
  }
  func.func @transform_0(%arg0: i32) -> (i32, i32) {
    %c0_i32 = arith.constant 0 : i32
    %c0_i32_0 = arith.constant 0 : i32
    return %arg0, %c0_i32 : i32, i32
  }
  func.func @transform_1(%arg0: i32) -> (i32, i32) {
    %c0_i32 = arith.constant 0 : i32
    %c0_i32_0 = arith.constant 0 : i32
    %c0_i32_1 = arith.constant 0 : i32
    return %c0_i32, %c0_i32_0 : i32, i32
  }
  func.func @transform_2(%arg0: i32) -> (i32, i32) {
    %c0_i32 = arith.constant 0 : i32
    %c0_i32_0 = arith.constant 0 : i32
    %c0_i32_1 = arith.constant 0 : i32
    return %c0_i32, %c0_i32_0 : i32, i32
  }
  func.func @transform_3(%arg0: i32) -> (i32, i32) {
    %c0_i32 = arith.constant 0 : i32
    %c0_i32_0 = arith.constant 0 : i32
    %c0_i32_1 = arith.constant 0 : i32
    return %c0_i32, %c0_i32_0 : i32, i32
  }
  func.func @transform_4(%arg0: i32) -> (i32, i32) {
    %c0_i32 = arith.constant 0 : i32
    %c0_i32_0 = arith.constant 0 : i32
    return %arg0, %c0_i32 : i32, i32
  }
}

</mosaic_0001>

<bundles_post_ra>
// kernel: tpu_custom_call.1
= control target key start
LH: loop header
LB: loop body
LE: loop exit
PB: predicated region body
PF: predicated region fallthrough
CT: control target
= control target key end

     0   :  { %s530_s0 = inlined_call_operand.vmem [shape: s32[8,4], index: 0, kind: input, shape index: {}]   ;;  %s531_s1 = inlined_call_operand.vmem [shape: f32[8,32], index: 1, kind: input, shape index: {}]   ;;  %s532_s2 = inlined_call_operand.vmem [shape: f32[32,1], index: 2, kind: input, shape index: {}]   ;;  %s533_s3 = inlined_call_operand.vmem [shape: f32[32,1], index: 3, kind: input, shape index: {}]   ;;  %s534_s4 = inlined_call_operand.hbm [shape: f32[8,32], index: 4, kind: output, shape index: {}]  }
   0x1   :  { %v30_v0 = vld [vmem:[%s530_s0] sm:$0xff] }
   0x2   :  { %9 = vsyncpa [#allocation3], 0  ;;  %v430_v1 = vmov 0   ;;  %v431_v2 = vmov 2   ;;  %v432_v3 = vmov 1   ;;  %v18_v4 = vld [vmem:[%s531_s1] sm:$0xff]  ;;  %v55_v9 = vlaneseq }
   0x3   :  { %389 = vset.pattern.permute.xlu0 %v430_v1  ;;  %391 = vset.pattern.permute.xlu1 %v431_v2  ;;  %v433_v5 = vmov 3   ;;  %v29_v6 = vld [vmem:[%s533_s3 + $0x18] sm:$0xff]  ;;  %v28_v7 = vld [vmem:[%s533_s3 + $0x10] sm:$0xff]  ;;  %v27_v8 = vld [vmem:[%s533_s3 + $0x8] sm:$0xff]  ;;  %vm63_vm0 = vcmask 64512   ;;  %v434_v12 = vmov 0.0  }
   0x4   :  { %58 = vperm.xlu0 %389, %v30_v0   ;;  %163 = vperm.xlu1 %391, %v30_v0   ;;  %v56_v10 = vand.u32 127, %v55_v9  ;;  %v26_v18 = vld [vmem:[%s533_s3] sm:$0xff]  ;;  %v25_v19 = vld [vmem:[%s532_s2 + $0x18] sm:$0xff]  ;;  %v24_v20 = vld [vmem:[%s532_s2 + $0x10] sm:$0xff]  ;;  %vm31_vm4 = vcmask 261120   ;;  %s436_s6 = smov 2  }
   0x5   :  { %393 = vset.pattern.permute.xlu2 %v430_v1  ;;  %82 = vmatpush.msra.mxu1 %v18_v4  ;;  %v23_v21 = vld [vmem:[%s532_s2 + $0x8] sm:$0xff]  ;;  %v22_v22 = vld [vmem:[%s532_s2] sm:$0xff]  ;;  %s435_s2 = smov 1   ;;  %s437_s7 = smov 3   ;;  %vm278_vm6 = vcmask 7168   ;;  %vm280_vm7 = vcmask 15360  }
   0x6   :  { %134 = vmatpush.msra.mxu3 %v18_v4  ;;  %102 = vmatpush.msra.mxu2 %v29_v6  ;;  %vm282_vm8 = vcmask 23552   ;;  %vm293_vm10 = vcmask 31744   ;;  %s438_s8 = smov [#allocation2]   ;;  %s357_s12 = sshll.u32 %s534_s4, 4  ;;  %s358_s12 = int_to_ptr.hbm [resolvable:$true] %s357_s12 }
   0x7   :  { %154 = vmatpush.msrb.mxu1 %v29_v6  ;;  %47 = vmatpush.msra.mxu0 %v25_v19  ;;  %s355_s9 = sshll.u32 %s438_s8, 4  ;;  %s356_s9 = int_to_ptr.vmem [resolvable:$true] %s355_s9 }
   0x8   :  { %186 = vmatpush.msrb.mxu3 %v18_v4  ;;  %103 = vmatpush.msra.mxu2 %v28_v7 }
   0x9   :  { %155 = vmatpush.msrb.mxu1 %v28_v7  ;;  %48 = vmatpush.msra.mxu0 %v24_v20 }
   0xa   :  { %104 = vmatpush.msra.mxu2 %v27_v8 }
   0xb   :  { %156 = vmatpush.msrb.mxu1 %v27_v8  ;;  %49 = vmatpush.msra.mxu0 %v23_v21 }
   0xc   :  { %390 = vset.pattern.permute.xlu0 %v432_v3  ;;  %392 = vset.pattern.permute.xlu1 %v433_v5 }
   0xd   :  { %111 = vperm.xlu0 %390, %v30_v0   ;;  %215 = vperm.xlu1 %392, %v30_v0  }
   0xe   :  { %105 = vmatpush.msra.mxu2 %v26_v18  ;;  %157 = vmatpush.msrb.mxu1 %v26_v18 }
   0xf   :  { %50 = vmatpush.msra.mxu0 %v22_v22 }
  0x10   :  { %238 = vmatpush.msrb.mxu2 %v18_v4  ;;  %366 = vmatmul.msk.f32.vlgmr.msra.gmra.mxu0 %vm31_vm4, %v18_v4 }
  0x11   :  { %206 = vmatpush.msrb.mxu0 %v29_v6 }
  0x13   :  { %207 = vmatpush.msrb.mxu0 %v28_v7 }
  0x15   :  { %397 = vset.pattern.permute.xlu0 %v433_v5  ;;  %208 = vmatpush.msrb.mxu0 %v27_v8 }
  0x17   :  { %209 = vmatpush.msrb.mxu0 %v26_v18 }
  0x76   :  { %v59_v11 = vpop.permute.xlu0 %58  ;;  %v164_v16 = vpop.permute.xlu1 %163 }
  0x77   :  { %vm60_vm1 = vcmp.eq.s32.totalorder %v59_v11, %v56_v10  ;;  %vm165_vm3 = vcmp.eq.s32.totalorder %v164_v16, %v56_v10 }
  0x78   :  { %v367_v13 = vsel %vm60_vm1, 1.0, %v434_v12  ;;  %v373_v17 = vsel %vm165_vm3, 1.0, %v434_v12 }
  0x79   :  { %368 = vmatmul.msk.f32.vlgmr.msra.gmra.mxu1 %vm63_vm0, %v367_v13 }
  0x7a   :  { %258 = vmatpush.msra.mxu1 %v29_v6 }
  0x7c   :  { %259 = vmatpush.msra.mxu1 %v28_v7 }
  0x7e   :  { %260 = vmatpush.msra.mxu1 %v27_v8 }
  0x7f   :  { %v112_v14 = vpop.permute.xlu0 %111  ;;  %v216_v24 = vpop.permute.xlu1 %215 }
  0x80   :  { %vm113_vm2 = vcmp.eq.s32.totalorder %v112_v14, %v56_v10  ;;  %261 = vmatpush.msra.mxu1 %v26_v18  ;;  %vm217_vm5 = vcmp.eq.s32.totalorder %v216_v24, %v56_v10 }
  0x81   :  { %v370_v15 = vsel %vm113_vm2, 1.0, %v434_v12  ;;  %v376_v25 = vsel %vm217_vm5, 1.0, %v434_v12 }
  0x82   :  { %371 = vmatmul.msk.f32.vlgmr.msra.gmra.mxu3 %vm63_vm0, %v370_v15 }
  0x8a   :  { %374 = vmatmul.msk.f32.vlgmr.msrb.gmra.mxu3 %vm63_vm0, %v373_v17 }
  0x8d   :  { %v52_v29 = vpop.f32.mrf.mxu0 }
  0xf6   :  { %v502_v23 = vpop.f32.mrf.mxu1 }
  0xf7   :  { %369 = vmatmul.msk.f32.vlgmr.msra.gmra.mxu2 %vm31_vm4, %v502_v23 }
  0xff   :  { %377 = vmatmul.msk.f32.vlgmr.msrb.gmra.mxu2 %vm63_vm0, %v376_v25 }
 0x105   :  { %v507_v26 = vpop.f32.mrf.mxu3 }
 0x106   :  { %372 = vmatmul.msk.f32.vlgmr.msrb.gmra.mxu1 %vm31_vm4, %v507_v26 }
 0x10d   :  { %v511_v27 = vpop.f32.mrf.mxu3 }
 0x10e   :  { %375 = vmatmul.msk.f32.vlgmr.msrb.gmra.mxu0 %vm31_vm4, %v511_v27 }
 0x17a   :  { %v107_v28 = vpop.f32.mrf.mxu2 }
 0x182   :  { %v515_v30 = vpop.f32.mrf.mxu2 }
 0x183   :  { %v159_v31 = vpop.f32.mrf.mxu1  ;;  %378 = vmatmul.msk.f32.vlgmr.msra.gmra.mxu1 %vm31_vm4, %v515_v30 }
 0x184   :  { %267 = vrot.lane.b32.xlu2 %v159_v31, %s435_s2 }
 0x18b   :  { %v211_v32 = vpop.f32.mrf.mxu0 }
 0x18c   :  { %271 = vrot.lane.b32.xlu2 %v211_v32, %s436_s6 }
 0x194   :  { %286 = vperm.xlu2 %393, %v52_v29  }
 0x1de   :  { %v268_v34 = vpop.permute.xlu2 %267 }
 0x1df   :  { %v279_v36 = vsel %vm278_vm6, %v107_v28, %v268_v34 }
 0x1e6   :  { %v272_v35 = vpop.permute.xlu2 %271 }
 0x1e7   :  { %v281_v37 = vsel %vm280_vm7, %v279_v36, %v272_v35 }
 0x1ee   :  { %v287_v39 = vpop.permute.xlu2 %286 }
 0x200   :  { %v263_v33 = vpop.f32.mrf.mxu1 }
 0x201   :  { %275 = vrot.lane.b32.xlu1 %v263_v33, %s437_s7 }
 0x273   :  { %v276_v38 = vpop.permute.xlu1 %275 }
 0x274   :  { %v283_v40 = vsel %vm282_vm8, %v281_v37, %v276_v38 }
 0x275   :  { %v289_v41 = vadd.f32 %v287_v39, %v283_v40 }
 0x277   :  { %vm290_vm9 = vcmp.ge.f32.partialorder %v289_v41, 0.0  ;;  %v291_v42 = vmul.f32 0.01, %v289_v41 }
 0x279   :  { %v292_v43 = vsel %vm290_vm9, %v289_v41, %v291_v42 }
 0x27a   :  { %v294_v44 = vsel %vm293_vm10, %v292_v43, -inf }
 0x27b   :  { %295 = vmax.xlane.f32.xlu0 %v294_v44 }
 0x2ee   :  { %v296_v45 = vpop.xlane.xlu0 %295 }
 0x2ef   :  { %v297_v46 = vsub.f32 %v292_v43, %v296_v45 }
 0x2f1   :  { %v298_v47 = vmul.f32 1.442695, %v297_v46 }
 0x2f3   :  { %398 = vpow2.f32 %v298_v47 }
 0x2f9   :  { %v399_v48 = vpop.eup %398 }
 0x2fa   :  { %v300_v49 = vsel %vm293_vm10, %v399_v48, 0.0 }
 0x2fb   :  { %301 = vadd.xlane.f32.xlu1 %v300_v49 }
 0x36e   :  { %v302_v50 = vpop.xlane.xlu1 %301 }
 0x36f   :  { %400 = vrcp.f32 %v302_v50  ;;  %v314_v54 = vand.u32 2147483648, %v302_v50  ;;  %v312_v56 = vand.u32 2147483647, %v302_v50  ;;  %vm308_vm12 = vweird.f32 %v302_v50 }
 0x371   :  { %v315_v58 = vor.u32 1.1754944e-38, %v314_v54  ;;  %vm313_vm14 = vcmp.eq.f32.partialorder %v312_v56, 8.507059e+37 }
 0x375   :  { %v401_v51 = vpop.eup %400 }
 0x376   :  { %v304_v52 = vmul.f32 %v401_v51, %v302_v50  ;;  %vm309_vm11 = vweird.f32 %v401_v51 }
 0x377   :  { %vm310_vm13 = vmor %vm308_vm12, %vm309_vm11 }
 0x378   :  { %v305_v53 = vsub.f32 1.0, %v304_v52 }
 0x37a   :  { %v306_v55 = vmul.f32 %v401_v51, %v305_v53 }
 0x37c   :  { %v307_v57 = vadd.f32 %v401_v51, %v306_v55 }
 0x37e   :  { %v311_v59 = vsel %vm310_vm13, %v401_v51, %v307_v57 }
 0x37f   :  { %v316_v60 = vsel %vm313_vm14, %v315_v58, %v311_v59 }
 0x380   :  { %v317_v61 = vmul.f32 %v399_v48, %v316_v60 }
 0x382   :  { %320 = vperm.xlu2 %393, %v317_v61  }
 0x38a   :  { %394 = vset.pattern.permute.xlu2 %v432_v3 }
 0x38b   :  { %326 = vperm.xlu2 %394, %v317_v61  }
 0x393   :  { %395 = vset.pattern.permute.xlu2 %v431_v2 }
 0x394   :  { %332 = vperm.xlu2 %395, %v317_v61  }
 0x39c   :  { %396 = vset.pattern.permute.xlu2 %v433_v5 }
 0x39d   :  { %338 = vperm.xlu2 %396, %v317_v61  }
 0x3dc   :  { %v321_v62 = vpop.permute.xlu2 %320 }
 0x3dd   :  { %v323_v4 = vmul.f32 %v321_v62, %v502_v23 }
 0x3e5   :  { %v327_v63 = vpop.permute.xlu2 %326 }
 0x3e6   :  { %v329_v1 = vmul.f32 %v327_v63, %v507_v26 }
 0x3e8   :  { %v330_v7 = vadd.f32 %v329_v1, %v323_v4 }
 0x3ee   :  { %v333_v0 = vpop.permute.xlu2 %332 }
 0x3ef   :  { %v335_v6 = vmul.f32 %v333_v0, %v511_v27 }
 0x3f1   :  { %v336_v9 = vadd.f32 %v335_v6, %v330_v7 }
 0x3f7   :  { %v339_v8 = vpop.permute.xlu2 %338 }
 0x3f8   :  { %v341_v3 = vmul.f32 %v339_v8, %v515_v30 }
 0x3fa   :  { %v342_v10 = vadd.f32 %v341_v3, %v336_v9 }
 0x3fc   :  { %v344_v2 = vmin.f32 %v342_v10, 0.0  ;;  %vm343_vm15 = vcmp.gt.f32.partialorder %v342_v10, 0.0 }
 0x3fe   :  { %v345_v11 = vmul.f32 1.442695, %v344_v2 }
 0x400   :  { %402 = vpow2.f32 %v345_v11 }
 0x406   :  { %v403_v5 = vpop.eup %402 }
 0x407   :  { %v379_v12 = vadd.f32 -1.0, %v403_v5 }
 0x409   :  { %v348_v13 = vsel %vm343_vm15, %v342_v10, %v379_v12 }
 0x40a   :  { %349 = vst.msk [vmem:[#allocation2] sm:$0xff] %vm31_vm4, %v348_v13 }
 0x40b   :  { %360 = dma.vmem_to_hbm [thread:$0]  %s356_s9, 128, %s358_s12, [#allocation3]  }
 0x40c   :  { %428 = dma.done.wait [#allocation3], 128  }
 0x40d   :  { %429 = vsyncadd [#allocation3], 4294967168 }
 0x40e   :  { %365 = vsyncpa [#allocation3], 1 }

</bundles_post_ra>
